<compile_context>
chip_gen: v5e
topology: v5e:2x2
jax: 0.10.0
libtpu: 0.0.40
codegen_flags: <defaults>
</compile_context>

<pallas_src>
from functools import partial
from math import sqrt

import jax
import jax.numpy as jnp
from jax import lax
from jax.experimental import pallas as pl
from jax.experimental.pallas import tpu as pltpu

_LANE = 128
_MASK_VALUE = -1e30


def _round_up(x, m):
    return ((x + m - 1) // m) * m


def _vmem_limit(est_bytes):
    # 2x the static tile estimate for compiler temporaries / double-buffer
    # slack; floor 16 MiB; capped at 48 MiB to keep headroom on v7x (64 MiB/TC).
    return int(min(48 * 1024 * 1024, max(16 * 1024 * 1024, 2 * est_bytes)))


# ----------------------------- fused QKV projection -------------------------

def _qkv_projection_kernel(x_ref, w_ref, q_ref, k_ref, v_ref, *, dk_p, compute_dtype):
    # x_ref : (1, tp, din_p)
    # w_ref : (din_p, 2*dk_p + dv_p)   == [Wq*(1/sqrt(dim_k)) | Wk | Wv]
    # q_ref : (1, tp, dk_p)  k_ref : (1, tp, dk_p)  v_ref : (1, tp, dv_p)
    x = x_ref[0]
    if x.dtype != compute_dtype:
        x = x.astype(compute_dtype)
    qkv = jnp.dot(x, w_ref[...], preferred_element_type=jnp.float32)
    q_ref[0] = qkv[:, :dk_p].astype(q_ref.dtype)
    k_ref[0] = qkv[:, dk_p:2 * dk_p].astype(k_ref.dtype)
    v_ref[0] = qkv[:, 2 * dk_p:].astype(v_ref.dtype)


# -------------------- flash attention (online softmax) ----------------------

def _flash_attention_kernel(q_ref, k_ref, v_ref, bias_ref, o_ref,
                            m_scr, l_scr, acc_scr, *, needs_mask):
    # q_ref   : (bt, tq, dk_p)   pre-projected, pre-scaled q
    # k_ref   : (bt, tk, dk_p)   pre-projected k
    # v_ref   : (bt, tk, dv_p)   pre-projected v
    # bias_ref: (1, tk)          0 for valid columns / -1e30 for padded columns
    # o_ref   : (bt, tq, dv_p)
    kv_idx = pl.program_id(2)

    @pl.when(kv_idx == 0)
    def _init():
        m_scr[...] = jnp.full_like(m_scr, _MASK_VALUE)
        l_scr[...] = jnp.zeros_like(l_scr)
        acc_scr[...] = jnp.zeros_like(acc_scr)

    # Scores: contract the shared feature dim directly -- no explicit k.T copy.
    s = lax.dot_general(
        q_ref[...], k_ref[...],
        dimension_numbers=(((2,), (2,)), ((0,), (0,))),
        preferred_element_type=jnp.float32,
    )  # (bt, tq, tk)

    if needs_mask:
        # Precomputed additive mask bias: one VPU add per step replaces the
        # previous per-step iota + compare + select.
        s = s + bias_ref[...]

    # Online softmax update.
    m_prev = m_scr[...]
    m_new = jnp.maximum(m_prev, jnp.max(s, axis=-1, keepdims=True))
    alpha = jnp.exp(m_prev - m_new)
    p = jnp.exp(s - m_new)
    l_scr[...] = alpha * l_scr[...] + jnp.sum(p, axis=-1, keepdims=True)
    pv = lax.dot_general(
        p.astype(v_ref.dtype), v_ref[...],
        dimension_numbers=(((2,), (1,)), ((0,), (0,))),
        preferred_element_type=jnp.float32,
    )  # (bt, tq, dv_p)
    acc_scr[...] = alpha * acc_scr[...] + pv
    m_scr[...] = m_new

    @pl.when(kv_idx == pl.num_programs(2) - 1)
    def _finalize():
        # Exact reciprocal (division): off the kv loop, tighter accuracy.
        o_ref[...] = (acc_scr[...] / l_scr[...]).astype(o_ref.dtype)


# --------------------------------- wrapper -----------------------------------

def self_attention(x, wq, wk, wv, *, use_bf16_compute=False):
    """x: (batch, n, dim_in); wq/wk: (dim_k, dim_in); wv: (dim_v, dim_in)
    (PyTorch nn.Linear weight layout, bias=False). Returns (batch, n, dim_v)."""
    batch, n, dim_in = x.shape
    dim_k, dim_v = wq.shape[0], wv.shape[0]
    assert wq.shape == (dim_k, dim_in) and wk.shape == (dim_k, dim_in)
    assert wv.shape == (dim_v, dim_in)
    dtype = x.dtype
    compute_dtype = (jnp.bfloat16 if (use_bf16_compute and dtype == jnp.float32)
                     else dtype)
    norm_fact = 1.0 / sqrt(dim_k)

    # ---- lane-dense feature padding (all tiles / outputs 128-lane dense).
    din_p = _round_up(dim_in, _LANE)
    dk_p = _round_up(dim_k, _LANE)
    dv_p = _round_up(dim_v, _LANE)
    dqkv_p = 2 * dk_p + dv_p

    # ---- sequence tiling: tq divides tk, n_p is a multiple of tk (and tq).
    cdt_bytes = jnp.dtype(compute_dtype).itemsize
    x_bytes = jnp.dtype(dtype).itemsize
    tq_cap, tk_cap = (256, 512) if cdt_bytes <= 2 else (128, 512)
    n8 = _round_up(n, 8)
    if n8 <= tq_cap:
        tq = tk = n8
    else:
        tq = tq_cap
        tk = tk_cap if n8 >= tk_cap else tq_cap
    n_p = _round_up(n, tk)
    needs_mask = (n_p != n)
    q_tiles = n_p // tq

    # ---- batch blocking: amortize per-step overhead but keep the parallel
    # grid extent >= 2 so the second TensorCore (v7x megacore) has work.
    max_bt = max(1, 512 // tq)
    bt = 1
    for d in range(min(batch, max_bt), 0, -1):
        if batch % d == 0 and ((batch // d) * q_tiles >= 2 or batch * q_tiles < 2):
            bt = d
            break

    # ---- pad x only when actually needed (avoid an unhidden HBM copy).
    if (n_p, din_p) != (n, dim_in):
        x_p = jnp.zeros((batch, n_p, din_p), dtype).at[:, :n, :dim_in].set(x)
    else:
        x_p = x

    # ---- fused padded weight [Wq*scale | Wk | Wv]  (din_p, dqkv_p).
    # TODO(synk): cache the padded/scaled weights (and aligned x) across calls
    # when the module weights are static.
    wqkv = jnp.zeros((din_p, dqkv_p), compute_dtype)
    wqkv = wqkv.at[:dim_in, :dim_k].set(
        (wq.astype(jnp.float32) * norm_fact).T.astype(compute_dtype))
    wqkv = wqkv.at[:dim_in, dk_p:dk_p + dim_k].set(wk.T.astype(compute_dtype))
    wqkv = wqkv.at[:dim_in, 2 * dk_p:2 * dk_p + dim_v].set(wv.T.astype(compute_dtype))

    # ---- additive padding-mask bias row (0 valid / -1e30 padded).
    col = jnp.arange(n_p)
    bias = jnp.where(col < n, 0.0, _MASK_VALUE).astype(jnp.float32)[None, :]

    # =============== pass 1: fused QKV projection (once per row) ============
    tp = tk  # n_p % tp == 0
    proj_est = (2 * (tp * din_p * x_bytes + din_p * dqkv_p * cdt_bytes)
                + 2 * tp * dqkv_p * cdt_bytes + tp * dqkv_p * 4)
    q, k, v = pl.pallas_call(
        partial(_qkv_projection_kernel, dk_p=dk_p, compute_dtype=compute_dtype),
        out_shape=(
            jax.ShapeDtypeStruct((batch, n_p, dk_p), compute_dtype),
            jax.ShapeDtypeStruct((batch, n_p, dk_p), compute_dtype),
            jax.ShapeDtypeStruct((batch, n_p, dv_p), compute_dtype),
        ),
        grid_spec=pltpu.PrefetchScalarGridSpec(
            num_scalar_prefetch=0,
            grid=(batch, n_p // tp),
            in_specs=[
                pl.BlockSpec((1, tp, din_p), lambda b, i: (b, i, 0)),   # x rows
                pl.BlockSpec((din_p, dqkv_p), lambda b, i: (0, 0)),     # fused W
            ],
            out_specs=[
                pl.BlockSpec((1, tp, dk_p), lambda b, i: (b, i, 0)),
                pl.BlockSpec((1, tp, dk_p), lambda b, i: (b, i, 0)),
                pl.BlockSpec((1, tp, dv_p), lambda b, i: (b, i, 0)),
            ],
        ),
        compiler_params=pltpu.CompilerParams(
            dimension_semantics=("parallel", "parallel"),
            vmem_limit_bytes=_vmem_limit(proj_est),
        ),
    )(x_p, wqkv)

    # =============== pass 2: flash attention over projected q/k/v ===========
    flash_est = (2 * bt * (tq * dk_p + tk * dk_p + tk * dv_p) * cdt_bytes
                 + 2 * tk * 4
                 + 2 * bt * tq * dv_p * x_bytes
                 + bt * tq * (dv_p + 2) * 4
                 + 2 * bt * tq * tk * 4)
    grid = (batch // bt, q_tiles, n_p // tk)
    out_p = pl.pallas_call(
        partial(_flash_attention_kernel, needs_mask=needs_mask),
        out_shape=jax.ShapeDtypeStruct((batch, n_p, dv_p), dtype),
        grid_spec=pltpu.PrefetchScalarGridSpec(
            num_scalar_prefetch=0,
            grid=grid,
            in_specs=[
                pl.BlockSpec((bt, tq, dk_p), lambda b, qi, ki: (b, qi, 0)),  # q
                pl.BlockSpec((bt, tk, dk_p), lambda b, qi, ki: (b, ki, 0)),  # k
                pl.BlockSpec((bt, tk, dv_p), lambda b, qi, ki: (b, ki, 0)),  # v
                pl.BlockSpec((1, tk), lambda b, qi, ki: (0, ki)),            # mask bias
            ],
            out_specs=pl.BlockSpec((bt, tq, dv_p), lambda b, qi, ki: (b, qi, 0)),
            scratch_shapes=[
                pltpu.VMEM((bt, tq, 1), jnp.float32),     # running max
                pltpu.VMEM((bt, tq, 1), jnp.float32),     # running sum
                pltpu.VMEM((bt, tq, dv_p), jnp.float32),  # output accumulator
            ],
        ),
        compiler_params=pltpu.CompilerParams(
            dimension_semantics=("parallel", "parallel", "arbitrary"),
            vmem_limit_bytes=_vmem_limit(flash_est),
        ),
    )(q, k, v, bias)

    return out_p[:, :n, :dim_v]


def self_attention_ref(x, wq, wk, wv):
    """Pure-JAX reference mirroring the PyTorch forward."""
    dim_k = wq.shape[0]
    q = jnp.einsum("bnd,kd->bnk", x, wq)
    k = jnp.einsum("bnd,kd->bnk", x, wk)
    v = jnp.einsum("bnd,vd->bnv", x, wv)
    dist = jnp.einsum("bik,bjk->bij", q, k) * (1.0 / sqrt(dim_k))
    dist = jax.nn.softmax(dist, axis=-1)
    return jnp.einsum("bij,bjv->biv", dist, v)


if __name__ == "__main__":
    def make_case(key, batch, n, dim_in, dim_k, dim_v):
        kx, kq, kk, kv = jax.random.split(key, 4)
        bound = 1.0 / sqrt(dim_in)
        x = jax.random.normal(kx, (batch, n, dim_in), dtype=jnp.float32)
        wq = jax.random.uniform(kq, (dim_k, dim_in), jnp.float32, -bound, bound)
        wk = jax.random.uniform(kk, (dim_k, dim_in), jnp.float32, -bound, bound)
        wv = jax.random.uniform(kv, (dim_v, dim_in), jnp.float32, -bound, bound)
        return x, wq, wk, wv

    k1, k2 = jax.random.split(jax.random.PRNGKey(0))

    # Case 1: small shapes matching the module's intended test.
    x, wq, wk, wv = make_case(k1, batch=2, n=8, dim_in=32, dim_k=16, dim_v=16)
    out = jax.block_until_ready(self_attention(x, wq, wk, wv))
    ref = jax.block_until_ready(self_attention_ref(x, wq, wk, wv))
    assert out.shape == ref.shape == (2, 8, 16)
    assert jnp.allclose(out, ref, atol=5e-3, rtol=5e-3), (
        f"case1 max abs err {jnp.max(jnp.abs(out - ref))}")

    # Case 2: unaligned dims + multiple q/kv tiles (exercises padding, the
    # additive kv mask and the online-softmax accumulation across kv steps).
    x, wq, wk, wv = make_case(k2, batch=2, n=200, dim_in=24, dim_k=40, dim_v=56)
    out = jax.block_until_ready(self_attention(x, wq, wk, wv))
    ref = jax.block_until_ready(self_attention_ref(x, wq, wk, wv))
    assert out.shape == ref.shape == (2, 200, 56)
    assert jnp.allclose(out, ref, atol=5e-3, rtol=5e-3), (
        f"case2 max abs err {jnp.max(jnp.abs(out - ref))}")

    # Case 3: opt-in bf16-compute path (f32 accumulation), looser tolerance.
    out = jax.block_until_ready(
        self_attention(x, wq, wk, wv, use_bf16_compute=True))
    assert jnp.allclose(out, ref, atol=5e-2, rtol=5e-2), (
        f"case3 max abs err {jnp.max(jnp.abs(out - ref))}")

    print("KERNEL_OK")
</pallas_src>

<mosaic_0001>
module attributes {stable_mosaic.version = 11 : i64} {
  func.func @_qkv_projection_kernel(%arg0: i32, %arg1: i32, %arg2: memref<1x8x128xf32, #tpu.memory_space<vmem>>, %arg3: memref<128x384xf32, #tpu.memory_space<vmem>>, %arg4: memref<1x8x128xf32, #tpu.memory_space<vmem>>, %arg5: memref<1x8x128xf32, #tpu.memory_space<vmem>>, %arg6: memref<1x8x128xf32, #tpu.memory_space<vmem>>) attributes {dimension_semantics = [#tpu.dimension_semantics<parallel>, #tpu.dimension_semantics<parallel>], iteration_bounds = array<i64: 2, 1>, scalar_prefetch = 0 : i64, scratch_operands = 0 : i64, tpu.core_type = #tpu.core_type<tc>, window_params = [{transform_indices = @transform_0, window_bounds = array<i64: 1, 8, 128>}, {pipeline_mode = #tpu.pipeline_mode<synchronous>, transform_indices = @transform_1, window_bounds = array<i64: 128, 384>}, {transform_indices = @transform_2, window_bounds = array<i64: 1, 8, 128>}, {transform_indices = @transform_3, window_bounds = array<i64: 1, 8, 128>}, {transform_indices = @transform_4, window_bounds = array<i64: 1, 8, 128>}]} {
    %c0 = arith.constant 0 : index
    %c0_0 = arith.constant 0 : index
    %c0_1 = arith.constant 0 : index
    %0 = vector.load %arg2[%c0, %c0_0, %c0_1] : memref<1x8x128xf32, #tpu.memory_space<vmem>>, vector<1x8x128xf32>
    %1 = vector.shape_cast %0 : vector<1x8x128xf32> to vector<8x128xf32>
    %c0_2 = arith.constant 0 : index
    %c0_3 = arith.constant 0 : index
    %2 = vector.load %arg3[%c0_2, %c0_3] : memref<128x384xf32, #tpu.memory_space<vmem>>, vector<128x384xf32>
    %cst = arith.constant dense<0.000000e+00> : vector<8x384xf32>
    %3 = tpu.matmul %1, %2, %cst {dimension_numbers = #tpu.dot_dimension_numbers<[1], [0], [0], [1], [0, 0, 1, 1], [], []>} : vector<8x128xf32>, vector<128x384xf32>, vector<8x384xf32> -> vector<8x384xf32>
    %4 = vector.extract_strided_slice %3 {offsets = [0, 0], sizes = [8, 128], strides = [1, 1]} : vector<8x384xf32> to vector<8x128xf32>
    %c0_4 = arith.constant 0 : index
    %c0_5 = arith.constant 0 : index
    %c0_6 = arith.constant 0 : index
    %5 = vector.load %arg4[%c0_4, %c0_5, %c0_6] : memref<1x8x128xf32, #tpu.memory_space<vmem>>, vector<1x8x128xf32>
    %6 = vector.shape_cast %5 : vector<1x8x128xf32> to vector<8x128xf32>
    %7 = vector.shape_cast %4 : vector<8x128xf32> to vector<1x8x128xf32>
    tpu.vector_store %arg4[%c0_4, %c0_5, %c0_6], %7 {strides = array<i32>} : memref<1x8x128xf32, #tpu.memory_space<vmem>>, vector<1x8x128xf32>,
    %8 = vector.extract_strided_slice %3 {offsets = [0, 128], sizes = [8, 128], strides = [1, 1]} : vector<8x384xf32> to vector<8x128xf32>
    %c0_7 = arith.constant 0 : index
    %c0_8 = arith.constant 0 : index
    %c0_9 = arith.constant 0 : index
    %9 = vector.load %arg5[%c0_7, %c0_8, %c0_9] : memref<1x8x128xf32, #tpu.memory_space<vmem>>, vector<1x8x128xf32>
    %10 = vector.shape_cast %9 : vector<1x8x128xf32> to vector<8x128xf32>
    %11 = vector.shape_cast %8 : vector<8x128xf32> to vector<1x8x128xf32>
    tpu.vector_store %arg5[%c0_7, %c0_8, %c0_9], %11 {strides = array<i32>} : memref<1x8x128xf32, #tpu.memory_space<vmem>>, vector<1x8x128xf32>,
    %12 = vector.extract_strided_slice %3 {offsets = [0, 256], sizes = [8, 128], strides = [1, 1]} : vector<8x384xf32> to vector<8x128xf32>
    %c0_10 = arith.constant 0 : index
    %c0_11 = arith.constant 0 : index
    %c0_12 = arith.constant 0 : index
    %13 = vector.load %arg6[%c0_10, %c0_11, %c0_12] : memref<1x8x128xf32, #tpu.memory_space<vmem>>, vector<1x8x128xf32>
    %14 = vector.shape_cast %13 : vector<1x8x128xf32> to vector<8x128xf32>
    %15 = vector.shape_cast %12 : vector<8x128xf32> to vector<1x8x128xf32>
    tpu.vector_store %arg6[%c0_10, %c0_11, %c0_12], %15 {strides = array<i32>} : memref<1x8x128xf32, #tpu.memory_space<vmem>>, vector<1x8x128xf32>,
    return
  }
  func.func @transform_0(%arg0: i32, %arg1: i32) -> (i32, i32, i32) {
    %c0_i32 = arith.constant 0 : i32
    %c0_i32_0 = arith.constant 0 : i32
    return %arg0, %arg1, %c0_i32 : i32, i32, i32
  }
  func.func @transform_1(%arg0: i32, %arg1: i32) -> (i32, i32) {
    %c0_i32 = arith.constant 0 : i32
    %c0_i32_0 = arith.constant 0 : i32
    %c0_i32_1 = arith.constant 0 : i32
    return %c0_i32, %c0_i32_0 : i32, i32
  }
  func.func @transform_2(%arg0: i32, %arg1: i32) -> (i32, i32, i32) {
    %c0_i32 = arith.constant 0 : i32
    %c0_i32_0 = arith.constant 0 : i32
    return %arg0, %arg1, %c0_i32 : i32, i32, i32
  }
  func.func @transform_3(%arg0: i32, %arg1: i32) -> (i32, i32, i32) {
    %c0_i32 = arith.constant 0 : i32
    %c0_i32_0 = arith.constant 0 : i32
    return %arg0, %arg1, %c0_i32 : i32, i32, i32
  }
  func.func @transform_4(%arg0: i32, %arg1: i32) -> (i32, i32, i32) {
    %c0_i32 = arith.constant 0 : i32
    %c0_i32_0 = arith.constant 0 : i32
    return %arg0, %arg1, %c0_i32 : i32, i32, i32
  }
}

</mosaic_0001>

<bundles_post_ra>
// kernel: tpu_custom_call.1
= control target key start
LH: loop header
LB: loop body
LE: loop exit
PB: predicated region body
PF: predicated region fallthrough
CT: control target
= control target key end

     0   :  { %s1150_s0 = inlined_call_operand.hbm [shape: f32[2,8,128], index: 0, kind: input, shape index: {}]   ;;  %s1151_s1 = inlined_call_operand.hbm [shape: f32[128,384], index: 1, kind: input, shape index: {}]   ;;  %s1152_s2 = inlined_call_operand.hbm [shape: f32[2,8,128], index: 2, kind: output, shape index: {0}]   ;;  %s1153_s3 = inlined_call_operand.hbm [shape: f32[2,8,128], index: 3, kind: output, shape index: {1}]   ;;  %s1154_s4 = inlined_call_operand.hbm [shape: f32[2,8,128], index: 4, kind: output, shape index: {2}]  }
   0x1   :  { %1159 = sst [smem:[#allocation17_spill]] %s1150_s0 }
   0x2   :  { %10 = vsyncpa [#allocation3], 0 }
   0x3   :  { %12 = vsyncpa [#allocation3 + $0x1], 0 }
   0x4   :  { %13 = vsyncpa [#allocation6], 0 }
   0x5   :  { %14 = vsyncpa [#allocation4], 0 }
   0x6   :  { %16 = vsyncpa [#allocation4 + $0x1], 0 }
   0x7   :  { %17 = vsyncpa [#allocation9], 0 }
   0x8   :  { %19 = vsyncpa [#allocation9 + $0x1], 0  ;;  %s937_s15 = smov 0   ;;  %s939_s16 = smov 0  }
   0x9   :  { %s941_s17 = smov 0   ;;  %s943_s18 = smov 0  }
   0xa   :  { %s945_s19 = smov 0   ;;  %s947_s20 = smov 0  }
   0xb LB: > { %s968_s21 = sadd.s32 4294967295, %s907_s20   ;;  %p597_p0 = scmp.ge.s32.totalorder %s907_s20, 1  ;;  %s907_s20 = sphi %s947_s20, %s25_s20   ;;  %s903_s19 = sphi %s945_s19, %s1178_s19   ;;  %s899_s18 = sphi %s943_s18, %s1177_s18   ;;  %s895_s17 = sphi %s941_s17, %s1176_s17   ;;  %s891_s16 = sphi %s939_s16, %s1175_s16   ;;  %s887_s15 = sphi %s937_s15, %s1174_s15  }
   0xc   : > { %p60_p1 = scmp.eq.s32.totalorder %s968_s21, 0  ;;  %p175_p2 = scmp.lt.s32.totalorder %s907_s20, 3 }
   0xd   : > { %s186_s24 = sshll.u32 %s1151_s1, 4  ;;  %s909_s26 = smov [#allocation5]   ;;  %s187_s24 = int_to_ptr.hbm [resolvable:$true] %s186_s24 }
   0xe   : > { %p976_p3 = pnand %p597_p0, %p175_p2  ;;  %s188_s27 = sshll.u32 %s909_s26, 4  ;;  %s189_s27 = int_to_ptr.vmem [resolvable:$true] %s188_s27 }
   0xf   : > { %p599_p6 = scmp.ge.s32.totalorder %s907_s20, 2  ;;  %s910_s28 = smov 384  }
  0x10   : > { %p628_p4 = pneg %p976_p3  ;;  %s911_s29 = smov 24  }
  0x11   : > { %s1155_s30 = sadd.s32 4294967294, %s907_s20   ;;  %s37_s5 = sadd.s32 1, %s903_s19 }
  0x12   : > { %p629_p5 = pnand %p628_p4, %p60_p1  ;;  %s46_s6 = sadd.s32 1, %s895_s17 }
  0x13   : > { %p39_p7 = scmp.ge.s32.totalorder %s37_s5, 2  ;;  %p53_p8 = scmp.ne.s32.totalorder %s895_s17, %s891_s16 }
  0x14   : > { %631 = dma.hbm_to_vmem [thread:$0]  (!%p629_p5), %s187_s24, 6144, %s189_s27, [#allocation6], %s910_s28, %s910_s28, %s911_s29  }
  0x15   : > { %p54_p9 = scmp.eq.s32.totalorder %s907_s20, 0  ;;  %p59_p10 = scmp.ne.s32.totalorder %s891_s16, %s887_s15 }
  0x16   : > { %s1180_s5 = smov (%p39_p7, %s37_s5), 0  ;;  %p106_p13 = scmp.eq.s32.totalorder %s968_s21, 1 }
  0x17   : > { %p995_p11 = por %p54_p9, %p53_p8  ;;  %p1001_p12 = por %p60_p1, %p59_p10 }
  0x18   : > { %s41_s9 = ssub.s32 %s903_s19, %s1180_s5  ;;  %p112_p2 = scmp.eq.s32.totalorder %s1155_s30, 1 }
  0x19   : > { %p44_p0 = scmp.eq.s32.totalorder %s41_s9, 0  ;;  %p1010_p4 = por %p106_p13, %p53_p8 }
  0x1a   : > { %p647_p5 = scmp.lt.s32.totalorder %s907_s20, 2  ;;  %p1018_p7 = por %p112_p2, %p59_p10 }
  0x1b   : > { %s1016_s11 = scalar_select %p44_p0, %s895_s17, %s46_s6  }
  0x1c   : > { %s202_s13 = sand.u32 1, %s895_s17   ;;  %s601_s22 = sshll.u32 %s903_s19, 3 }
  0x1d   : > { %s600_s14 = sshll.u32 %s202_s13, 3  ;;  %s1165_s0 = sld [smem:[#allocation17_spill]] }
  0x1e   : > { %s206_s27 = scalar_lea.vmem [#allocation2], %s600_s14  ;;  %p633_p8 = pnand %p647_p5, %p995_p11 }
  0x1f   : > { %s215_s28 = sshll.u32 %s206_s27, 4  ;;  %s203_s6 = scalar_lea.sflag [#allocation3], %s202_s13  ;;  %s216_s28 = int_to_ptr.vmem [resolvable:$true] %s215_s28 }
  0x21   : > { %224 = sbr.rel (%p976_p3) target bundleno = 243 (0xf3), region = 28 }
  0x23   : > { %s211_s26 = scalar_lea.hbm %s1165_s0, %s601_s22 }
  0x24   : > { %s213_s29 = sshll.u32 %s211_s26, 4  ;;  %s214_s29 = int_to_ptr.hbm [resolvable:$true] %s213_s29 }
  0x25   : > { %635 = dma.hbm_to_vmem [thread:$0]  (!%p633_p8), %s214_s29, 128, %s216_s28, %s203_s6  }
  0x26   : > { %s1032_s9 = sand.u32 1, %s891_s16  }
  0x27   : > { %s1035_s23 = sshll.u32 %s1032_s9, 3  ;;  %s227_s14 = scalar_lea.sflag [#allocation3], %s1032_s9 }
  0x28   : > { %s230_s22 = scalar_lea.vmem [#allocation2], %s1035_s23 }
  0x29   : > { %870 = dma.done.wait (%p1001_p12), %s227_s14, 128  }
  0x2a   : > { %872 = vsyncadd (%p1001_p12), %s227_s14, 4294967168 }
  0x2b   : > { %874 = dma.done.wait (%p60_p1), [#allocation6], 6144  }
  0x2c   : > { %876 = vsyncadd (%p60_p1), [#allocation6], 4294961152  ;;  %v319_v0 = vld [vmem:[#allocation5 + $0x178] sm:$0xff]  ;;  %v316_v1 = vld [vmem:[#allocation5 + $0x160] sm:$0xff]  ;;  %s611_s25 = sshll.u32 %s899_s18, 3  ;;  %s263_s7 = scalar_lea.vmem [#allocation8], %s1035_s23 }
  0x2d   : > { %360 = vmatpush.msra.mxu2 %v319_v0  ;;  %v318_v2 = vld [vmem:[#allocation5 + $0x170] sm:$0xff]  ;;  %v317_v3 = vld [vmem:[#allocation5 + $0x168] sm:$0xff]  ;;  %v315_v5 = vld [vmem:[#allocation5 + $0x158] sm:$0xff]  ;;  %s1051_s8 = sshll.u32 %s263_s7, 4  ;;  %s420_s26 = scalar_lea.hbm %s1153_s3, %s611_s25  ;;  %s423_s8 = int_to_ptr.vmem [resolvable:$true] %s1051_s8 }
  0x2e   : > { %v313_v4 = vld [vmem:[#allocation5 + $0x148] sm:$0xff]  ;;  %340 = vmatpush.msra.mxu1 %v318_v2  ;;  %320 = vmatpush.msra.mxu0 %v317_v3  ;;  %v314_v6 = vld [vmem:[#allocation5 + $0x150] sm:$0xff]  ;;  %v312_v7 = vld [vmem:[#allocation5 + $0x140] sm:$0xff]  ;;  %s256_s27 = scalar_lea.vmem [#allocation7], %s1035_s23  ;;  %s405_s14 = scalar_lea.hbm %s1152_s2, %s611_s25 }
  0x2f   : > { %361 = vmatpush.msra.mxu2 %v316_v1  ;;  %v311_v8 = vld [vmem:[#allocation5 + $0x138] sm:$0xff]  ;;  %v310_v9 = vld [vmem:[#allocation5 + $0x130] sm:$0xff]  ;;  %v309_v10 = vld [vmem:[#allocation5 + $0x128] sm:$0xff]  ;;  %s1057_s28 = sshll.u32 %s256_s27, 4  ;;  %s388_s18 = sand.u32 1, %s968_s21  }
  0x30   : > { %341 = vmatpush.msra.mxu1 %v315_v5  ;;  %321 = vmatpush.msra.mxu0 %v314_v6  ;;  %v308_v11 = vld [vmem:[#allocation5 + $0x120] sm:$0xff]  ;;  %v307_v12 = vld [vmem:[#allocation5 + $0x118] sm:$0xff]  ;;  %v306_v13 = vld [vmem:[#allocation5 + $0x110] sm:$0xff]  ;;  %1166 = sst [smem:[#allocation15_spill]] %s1057_s28  ;;  %s1065_s30 = sshll.u32 %s405_s14, 4 }
  0x31   : > { %362 = vmatpush.msra.mxu2 %v313_v4  ;;  %v305_v14 = vld [vmem:[#allocation5 + $0x108] sm:$0xff]  ;;  %v304_v15 = vld [vmem:[#allocation5 + $0x100] sm:$0xff]  ;;  %v303_v16 = vld [vmem:[#allocation5 + $0xf8] sm:$0xff]  ;;  %1167 = sst [smem:[#allocation16_spill]] %s1065_s30  ;;  %s435_s24 = scalar_lea.hbm %s1154_s4, %s611_s25 }
  0x32   : > { %342 = vmatpush.msra.mxu1 %v312_v7  ;;  %322 = vmatpush.msra.mxu0 %v311_v8  ;;  %v302_v17 = vld [vmem:[#allocation5 + $0xf0] sm:$0xff]  ;;  %v301_v18 = vld [vmem:[#allocation5 + $0xe8] sm:$0xff]  ;;  %v300_v19 = vld [vmem:[#allocation5 + $0xe0] sm:$0xff]  ;;  %s270_s29 = scalar_lea.vmem [#allocation10], %s1035_s23  ;;  %s1076_s21 = sshll.u32 %s435_s24, 4  ;;  %s440_s21 = int_to_ptr.hbm [resolvable:$true] %s1076_s21 }
  0x33   : > { %363 = vmatpush.msra.mxu2 %v310_v9  ;;  %v299_v20 = vld [vmem:[#allocation5 + $0xd8] sm:$0xff]  ;;  %v298_v21 = vld [vmem:[#allocation5 + $0xd0] sm:$0xff]  ;;  %v297_v22 = vld [vmem:[#allocation5 + $0xc8] sm:$0xff]  ;;  %s1074_s6 = sshll.u32 %s270_s29, 4  ;;  %s438_s6 = int_to_ptr.vmem [resolvable:$true] %s1074_s6 }
  0x34   : > { %343 = vmatpush.msra.mxu1 %v309_v10  ;;  %323 = vmatpush.msra.mxu0 %v308_v11  ;;  %v296_v23 = vld [vmem:[#allocation5 + $0xc0] sm:$0xff]  ;;  %v295_v24 = vld [vmem:[#allocation5 + $0xb8] sm:$0xff]  ;;  %v294_v25 = vld [vmem:[#allocation5 + $0xb0] sm:$0xff] }
  0x35   : > { %364 = vmatpush.msra.mxu2 %v307_v12  ;;  %v293_v26 = vld [vmem:[#allocation5 + $0xa8] sm:$0xff]  ;;  %v292_v27 = vld [vmem:[#allocation5 + $0xa0] sm:$0xff]  ;;  %v291_v28 = vld [vmem:[#allocation5 + $0x98] sm:$0xff] }
  0x36   : > { %344 = vmatpush.msra.mxu1 %v306_v13  ;;  %324 = vmatpush.msra.mxu0 %v305_v14  ;;  %v290_v29 = vld [vmem:[#allocation5 + $0x90] sm:$0xff]  ;;  %v289_v30 = vld [vmem:[#allocation5 + $0x88] sm:$0xff]  ;;  %v288_v31 = vld [vmem:[#allocation5 + $0x80] sm:$0xff] }
  0x37   : > { %365 = vmatpush.msra.mxu2 %v304_v15  ;;  %v287_v32 = vld [vmem:[#allocation5 + $0x78] sm:$0xff]  ;;  %v286_v33 = vld [vmem:[#allocation5 + $0x70] sm:$0xff]  ;;  %v285_v34 = vld [vmem:[#allocation5 + $0x68] sm:$0xff] }
  0x38   : > { %345 = vmatpush.msra.mxu1 %v303_v16  ;;  %325 = vmatpush.msra.mxu0 %v302_v17  ;;  %v284_v35 = vld [vmem:[#allocation5 + $0x60] sm:$0xff]  ;;  %v283_v36 = vld [vmem:[#allocation5 + $0x58] sm:$0xff]  ;;  %v282_v37 = vld [vmem:[#allocation5 + $0x50] sm:$0xff] }
  0x39   : > { %366 = vmatpush.msra.mxu2 %v301_v18  ;;  %v281_v38 = vld [vmem:[#allocation5 + $0x48] sm:$0xff]  ;;  %v280_v39 = vld [vmem:[#allocation5 + $0x40] sm:$0xff]  ;;  %v279_v40 = vld [vmem:[#allocation5 + $0x38] sm:$0xff] }
  0x3a   : > { %346 = vmatpush.msra.mxu1 %v300_v19  ;;  %326 = vmatpush.msra.mxu0 %v299_v20  ;;  %v278_v41 = vld [vmem:[#allocation5 + $0x30] sm:$0xff]  ;;  %v277_v42 = vld [vmem:[#allocation5 + $0x28] sm:$0xff]  ;;  %v276_v43 = vld [vmem:[#allocation5 + $0x20] sm:$0xff] }
  0x3b   : > { %367 = vmatpush.msra.mxu2 %v298_v21  ;;  %v275_v44 = vld [vmem:[#allocation5 + $0x18] sm:$0xff]  ;;  %v274_v45 = vld [vmem:[#allocation5 + $0x10] sm:$0xff]  ;;  %v273_v47 = vld [vmem:[#allocation5 + $0x8] sm:$0xff] }
  0x3c   : > { %347 = vmatpush.msra.mxu1 %v297_v22  ;;  %327 = vmatpush.msra.mxu0 %v296_v23  ;;  %v271_v46 = vld [vmem:[%s230_s22] sm:$0xff]  ;;  %v272_v48 = vld [vmem:[#allocation5] sm:$0xff]  ;;  %s424_s22 = sshll.u32 %s420_s26, 4  ;;  %s1078_s26 = scalar_lea.sflag [#allocation9], %s388_s18  ;;  %s425_s22 = int_to_ptr.hbm [resolvable:$true] %s424_s22 }
  0x3d   : > { %368 = vmatpush.msra.mxu2 %v295_v24  ;;  %s775_s14 = sshra.s32 %s425_s22, 4  ;;  %s776_s14 = int_to_ptr.hbm [resolvable:$true] %s775_s14 }
  0x3e   : > { %348 = vmatpush.msra.mxu1 %v294_v25  ;;  %328 = vmatpush.msra.mxu0 %v293_v26  ;;  %s777_s0 = scalar_lea.hbm %s776_s14, 8  ;;  %p782_p10 = scmp.lt.s32.totalorder %s776_s14, %s1153_s3 }
  0x3f   : > { %369 = vmatpush.msra.mxu2 %v292_v27  ;;  %p778_p1 = scmp.ne.s32.totalorder %s776_s14, %s777_s0 }
  0x40   : > { %349 = vmatpush.msra.mxu1 %v291_v28  ;;  %329 = vmatpush.msra.mxu0 %v290_v29 }
  0x41   : > { %370 = vmatpush.msra.mxu2 %v289_v30  ;;  %p779_p3 = pnand %p778_p1, %p1010_p4 }
  0x42   : > { %350 = vmatpush.msra.mxu1 %v288_v31  ;;  %330 = vmatpush.msra.mxu0 %v287_v32 }
  0x43   : > { %371 = vmatpush.msra.mxu2 %v286_v33  ;;  %p780_p9 = pneg %p779_p3 }
  0x44   : > { %351 = vmatpush.msra.mxu1 %v285_v34  ;;  %331 = vmatpush.msra.mxu0 %v284_v35 }
  0x45   : > { %372 = vmatpush.msra.mxu2 %v283_v36 }
  0x46   : > { %352 = vmatpush.msra.mxu1 %v282_v37  ;;  %332 = vmatpush.msra.mxu0 %v281_v38 }
  0x47   : > { %373 = vmatpush.msra.mxu2 %v280_v39 }
  0x48   : > { %353 = vmatpush.msra.mxu1 %v279_v40  ;;  %333 = vmatpush.msra.mxu0 %v278_v41 }
  0x49   : > { %374 = vmatpush.msra.mxu2 %v277_v42 }
  0x4a   : > { %354 = vmatpush.msra.mxu1 %v276_v43  ;;  %334 = vmatpush.msra.mxu0 %v275_v44 }
  0x4b   : > { %375 = vmatpush.msra.mxu2 %v274_v45 }
  0x4c   : > { %376 = vmatmul.f32.vlgmr.msra.gmra.mxu2 %v271_v46  ;;  %355 = vmatpush.msra.mxu1 %v273_v47 }
  0x4d   : > { %335 = vmatpush.msra.mxu0 %v272_v48  ;;  %356 = vmatmul.f32.vlgmr.msra.gmra.mxu1 %v271_v46 }
  0x4e   : > { %336 = vmatmul.f32.vlgmr.msra.gmra.mxu0 %v271_v46 }
  0xca   : > { %v357_v49 = vpop.f32.mrf.mxu1 }
  0xcb   : > { %381 = vst [vmem:[%s263_s7] sm:$0xff] %v357_v49  ;;  %v337_v50 = vpop.f32.mrf.mxu0  ;;  %s781_s7 = scalar_lea.hbm %s1153_s3, 16 }
  0xcc   : > { %380 = vst [vmem:[%s256_s27] sm:$0xff] %v337_v50  ;;  %p783_p11 = scmp.lt.s32.totalorder %s781_s7, %s777_s0 }
  0xce   : > { %p784_p12 = por %p783_p11, %p782_p10 }
  0xd0   : > { %p785_p13 = pnand %p784_p12, %p780_p9 }
  0xd2   : > { %788 = shalt.err (!%p785_p13)
}
  0xd3   : > { %s1168_s27 = sld [smem:[#allocation16_spill]]  ;;  %s384_s18 = scalar_lea.sflag [#allocation4], %s1032_s9 }
  0xd4   : > { %623 = dma.vmem_to_hbm [thread:$0]  (%p1010_p4), %s423_s8, 128, %s425_s22, %s1078_s26  }
  0xd5   : > { %s809_s14 = scalar_lea.hbm %s1152_s2, 16 }
  0xd9   : > { %s1169_s24 = int_to_ptr.hbm [resolvable:$true] %s1168_s27 }
  0xda   : > { %s803_s25 = sshra.s32 %s1169_s24, 4  ;;  %s804_s25 = int_to_ptr.hbm [resolvable:$true] %s803_s25 }
  0xdb   : > { %s805_s13 = scalar_lea.hbm %s804_s25, 8  ;;  %p810_p8 = scmp.lt.s32.totalorder %s804_s25, %s1152_s2 }
  0xdc   : > { %p806_p0 = scmp.ne.s32.totalorder %s804_s25, %s805_s13  ;;  %p811_p1 = scmp.lt.s32.totalorder %s809_s14, %s805_s13 }
  0xde   : > { %p807_p2 = pnand %p806_p0, %p1010_p4  ;;  %p812_p3 = por %p811_p1, %p810_p8 }
  0xe0   : > { %p808_p5 = pneg %p807_p2 }
  0xe2   : > { %p813_p9 = pnand %p812_p3, %p808_p5 }
  0xe4   : > { %816 = shalt.err (!%p813_p9)
}
  0xe5   : > { %s1170_s9 = smov %s1169_s24  ;;  %s1171_s8 = sld [smem:[#allocation15_spill]]  ;;  %v377_v51 = vpop.f32.mrf.mxu2 }
  0xe6   : > { %382 = vst [vmem:[%s270_s29] sm:$0xff] %v377_v51  ;;  %s831_s24 = sshra.s32 %s440_s21, 4  ;;  %s837_s30 = scalar_lea.hbm %s1154_s4, 16  ;;  %s832_s24 = int_to_ptr.hbm [resolvable:$true] %s831_s24 }
  0xe7   : > { %s833_s25 = scalar_lea.hbm %s832_s24, 8  ;;  %p838_p13 = scmp.lt.s32.totalorder %s832_s24, %s1154_s4 }
  0xe8   : > { %p834_p10 = scmp.ne.s32.totalorder %s832_s24, %s833_s25  ;;  %p839_p0 = scmp.lt.s32.totalorder %s837_s30, %s833_s25 }
  0xea   : > { %p835_p11 = pnand %p834_p10, %p1010_p4  ;;  %p840_p2 = por %p839_p0, %p838_p13 }
  0xeb   : > { %s1172_s22 = int_to_ptr.vmem [resolvable:$true] %s1171_s8 }
  0xec   : > { %622 = dma.vmem_to_hbm [thread:$0]  (%p1010_p4), %s1172_s22, 128, %s1170_s9, %s384_s18  }
  0xed   : > { %p836_p12 = pneg %p835_p11 }
  0xef   : > { %p841_p5 = pnand %p840_p2, %p836_p12 }
  0xf1   : > { %844 = shalt.err (!%p841_p5)
}
  0xf2   : > { %624 = dma.vmem_to_hbm [thread:$0]  (%p1010_p4), %s438_s6, 128, %s440_s21, %s1078_s26  }
  0xf3 PF: > { %s451_s23 = sand.u32 1, %s887_s15   ;;  %p637_p8 = pnand %p599_p6, %p1018_p7 }
  0xf4   : > { %s452_s29 = scalar_lea.sflag [#allocation4], %s451_s23 }
  0xf5   : > { %p638_p1 = pneg %p637_p8 }
  0xf7   : > { %878 = dma.done.wait (%p638_p1), %s452_s29, 128  }
  0xf8   : > { %880 = vsyncadd (%p638_p1), %s452_s29, 4294967168  ;;  %s1173_s18 = sadd.s32 4294967294, %s907_s20  }
  0xf9   : > { %s461_s0 = sand.u32 1, %s1173_s18  }
  0xfa   : > { %s462_s7 = scalar_lea.sflag [#allocation9], %s461_s0 }
  0xfb   : > { %882 = dma.done.wait (%p638_p1), %s462_s7, 256  }
  0xfc   : > { %884 = vsyncadd (%p638_p1), %s462_s7, 4294967040  ;;  %s25_s20 = sadd.s32 1, %s907_s20   ;;  %s1174_s15 = smov %s891_s16 }
  0xfd   : > { %p22_p4 = scmp.ge.s32.totalorder %s25_s20, 4   ;;  %s1175_s16 = smov %s895_s17 }
  0xfe   : > { %s1176_s17 = smov %s1016_s11  ;;  %s1177_s18 = smov %s903_s19 }
  0xff   : > { %s1178_s19 = smov %s1180_s5  ;;  %24 = sbr.rel (!%p22_p4) target bundleno = 11 (0xb), region = 109 }
 0x104   :  { %478 = vsyncpa [#allocation3], 1 }
 0x105   :  { %480 = vsyncpa [#allocation3 + $0x1], 1 }
 0x106   :  { %481 = vsyncpa [#allocation6], 1 }
 0x107   :  { %482 = vsyncpa [#allocation4], 1 }
 0x108   :  { %484 = vsyncpa [#allocation4 + $0x1], 1 }
 0x109   :  { %485 = vsyncpa [#allocation9], 1 }
 0x10a   :  { %487 = vsyncpa [#allocation9 + $0x1], 1 }

</bundles_post_ra>
